<compile_context>
chip_gen: v7x
topology: tpu7x:2x2x1
jax: 0.10.0
libtpu: 0.0.40
codegen_flags: <defaults>
</compile_context>

<pallas_src>
import jax
import jax.numpy as jnp
from jax.experimental import pallas as pl
from jax.experimental.pallas import tpu as pltpu


# ------------------------- fused LSTM + ensemble kernel ---------------------- #

def _lstm_ensemble_kernel(x_ref, wx_ref, wh_ref, b_ref, weff_ref, beff_ref, out_ref):
    """Single invocation: whole (tiny) problem resident in VMEM.

    x_ref   : (S*B, D_in)  time-major flattened input
    wx_ref  : (D_in, 4H)   input->gates weights
    wh_ref  : (H, 4H)      hidden->gates weights
    b_ref   : (1, 4H)      gate bias
    weff_ref: (H, O)       softmax(alpha)-folded ensemble weight
    beff_ref: (1, O)       softmax(alpha)-folded ensemble bias
    out_ref : (B, O)
    """
    H = wh_ref.shape[0]
    B = out_ref.shape[0]
    SB = x_ref.shape[0]
    S = SB // B

    # Hoisted input projection: one tall matmul + bias, outside the recurrence.
    xw = jnp.dot(
        x_ref[...].astype(jnp.bfloat16),
        wx_ref[...].astype(jnp.bfloat16),
        preferred_element_type=jnp.float32,
    ) + b_ref[...]                                           # (S*B, 4H), f32

    wh = wh_ref[...].astype(jnp.bfloat16)                    # (H, 4H)

    h = jnp.zeros((B, H), jnp.float32)
    c = jnp.zeros((B, H), jnp.float32)

    # S is small & static -> fully unrolled; only the h @ Wh matmul is recurrent.
    # Per-step rows of xw are a contiguous sublane range (free static slice).
    for t in range(S):
        gates = xw[t * B:(t + 1) * B, :] + jnp.dot(
            h.astype(jnp.bfloat16), wh, preferred_element_type=jnp.float32
        )                                                    # (B, 4H), f32
        # PyTorch LSTM gate order: input, forget, cell(g), output.
        i_g = jax.nn.sigmoid(gates[:, 0 * H:1 * H])
        f_g = jax.nn.sigmoid(gates[:, 1 * H:2 * H])
        g_g = jnp.tanh(gates[:, 2 * H:3 * H])
        o_g = jax.nn.sigmoid(gates[:, 3 * H:4 * H])
        c = f_g * c + i_g * g_g
        h = o_g * jnp.tanh(c)

    # Auto-weighted ensemble, pre-folded to a single linear head.
    out_ref[...] = (
        jnp.dot(h, weff_ref[...], preferred_element_type=jnp.float32) + beff_ref[...]
    )
    # TODO(synk): per-step outputs `o` are not materialized (forward discards
    # them); if ever needed, accumulate a lane-dense (S, B*H) VMEM slab and
    # write it back once instead of per-step masked stores.


# ------------------------------ complete model ------------------------------ #

@jax.jit
def complete_model_forward(x, y_true, params):
    """x: (B, S, D_in) batch-first. y_true: (B, O) (unused in forward output)."""
    del y_true  # TODO(synk): ensemble_model's use of y_true is unspecified.

    B, S, D_in = x.shape
    H = params["wh"].shape[0]
    O = params["heads_w"].shape[-1]

    # Layout plumbing only: time-major flattened x so each timestep's rows are a
    # contiguous sublane range inside the kernel (fused into the jit program).
    x_tm = jnp.transpose(x, (1, 0, 2)).reshape(S * B, D_in)

    # Algebraic fold of the auto-weighted ensemble: all heads are linear, so
    # softmax(alpha)-weighted sum of predictions == one effective linear head.
    a = jax.nn.softmax(params["alpha"], axis=-1)[0]              # (K,)
    w_eff = jnp.einsum("k,kho->ho", a, params["heads_w"])        # (H, O)
    b_eff = jnp.einsum("k,kxo->xo", a, params["heads_b"])        # (1, O)

    vmem = lambda: pl.BlockSpec(memory_space=pltpu.MemorySpace.VMEM)
    out = pl.pallas_call(
        _lstm_ensemble_kernel,
        out_shape=jax.ShapeDtypeStruct((B, O), jnp.float32),
        in_specs=[vmem() for _ in range(6)],
        out_specs=vmem(),
    )(x_tm, params["wx"], params["wh"], params["b"], w_eff, b_eff)
    return out


def init_params(key, input_dim, hidden_dim, num_heads, out_dim):
    k = jax.random.split(key, 6)
    scale = 0.1
    return {
        # LSTM: combined input->gates and hidden->gates weights, combined bias.
        "wx": scale * jax.random.normal(k[0], (input_dim, 4 * hidden_dim), jnp.float32),
        "wh": scale * jax.random.normal(k[1], (hidden_dim, 4 * hidden_dim), jnp.float32),
        "b": scale * jax.random.normal(k[2], (1, 4 * hidden_dim), jnp.float32),
        # Ensemble: K linear heads + auto-weight logits.
        "heads_w": scale * jax.random.normal(k[3], (num_heads, hidden_dim, out_dim), jnp.float32),
        "heads_b": scale * jax.random.normal(k[4], (num_heads, 1, out_dim), jnp.float32),
        "alpha": jax.random.normal(k[5], (1, num_heads), jnp.float32),
    }


if __name__ == "__main__":
    B, S, D_IN, HID, K, OUT = 8, 8, 16, 32, 3, 8

    key = jax.random.PRNGKey(0)
    kx, ky, kp = jax.random.split(key, 3)
    x = jax.random.normal(kx, (B, S, D_IN), jnp.float32)
    y_true = jax.random.normal(ky, (B, OUT), jnp.float32)
    params = init_params(kp, D_IN, HID, K, OUT)

    out = complete_model_forward(x, y_true, params)
    jax.block_until_ready(out)

    assert out.shape == (B, OUT) and out.dtype == jnp.float32
    print("KERNEL_OK")
</pallas_src>

<mosaic_0001>
module attributes {stable_mosaic.version = 11 : i64} {
  func.func @_lstm_ensemble_kernel(%arg0: memref<64x16xf32, #tpu.memory_space<vmem>>, %arg1: memref<16x128xf32, #tpu.memory_space<vmem>>, %arg2: memref<32x128xf32, #tpu.memory_space<vmem>>, %arg3: memref<1x128xf32, #tpu.memory_space<vmem>>, %arg4: memref<32x8xf32, #tpu.memory_space<vmem>>, %arg5: memref<1x8xf32, #tpu.memory_space<vmem>>, %arg6: memref<8x8xf32, #tpu.memory_space<vmem>>) attributes {dimension_semantics = [], scalar_prefetch = 0 : i64, scratch_operands = 0 : i64, tpu.core_type = #tpu.core_type<tc>} {
    %c0 = arith.constant 0 : index
    %c0_0 = arith.constant 0 : index
    %0 = vector.load %arg0[%c0, %c0_0] : memref<64x16xf32, #tpu.memory_space<vmem>>, vector<64x16xf32>
    %1 = arith.truncf %0 : vector<64x16xf32> to vector<64x16xbf16>
    %c0_1 = arith.constant 0 : index
    %c0_2 = arith.constant 0 : index
    %2 = vector.load %arg1[%c0_1, %c0_2] : memref<16x128xf32, #tpu.memory_space<vmem>>, vector<16x128xf32>
    %3 = arith.truncf %2 : vector<16x128xf32> to vector<16x128xbf16>
    %cst = arith.constant dense<0.000000e+00> : vector<64x128xf32>
    %4 = tpu.matmul %1, %3, %cst {dimension_numbers = #tpu.dot_dimension_numbers<[1], [0], [0], [1], [0, 0, 1, 1], [], []>} : vector<64x16xbf16>, vector<16x128xbf16>, vector<64x128xf32> -> vector<64x128xf32>
    %c0_3 = arith.constant 0 : index
    %c0_4 = arith.constant 0 : index
    %5 = vector.load %arg3[%c0_3, %c0_4] : memref<1x128xf32, #tpu.memory_space<vmem>>, vector<1x128xf32>
    %6 = vector.broadcast %5 : vector<1x128xf32> to vector<64x128xf32>
    %7 = arith.addf %4, %6 : vector<64x128xf32>
    %c0_5 = arith.constant 0 : index
    %c0_6 = arith.constant 0 : index
    %8 = vector.load %arg2[%c0_5, %c0_6] : memref<32x128xf32, #tpu.memory_space<vmem>>, vector<32x128xf32>
    %9 = arith.truncf %8 : vector<32x128xf32> to vector<32x128xbf16>
    %cst_7 = arith.constant 0.000000e+00 : f32
    %10 = vector.broadcast %cst_7 : f32 to vector<8x32xf32>
    %cst_8 = arith.constant 0.000000e+00 : f32
    %11 = vector.broadcast %cst_8 : f32 to vector<8x32xf32>
    %12 = vector.extract_strided_slice %7 {offsets = [0, 0], sizes = [8, 128], strides = [1, 1]} : vector<64x128xf32> to vector<8x128xf32>
    %13 = arith.truncf %10 : vector<8x32xf32> to vector<8x32xbf16>
    %cst_9 = arith.constant dense<0.000000e+00> : vector<8x128xf32>
    %14 = tpu.matmul %13, %9, %cst_9 {dimension_numbers = #tpu.dot_dimension_numbers<[1], [0], [0], [1], [0, 0, 1, 1], [], []>} : vector<8x32xbf16>, vector<32x128xbf16>, vector<8x128xf32> -> vector<8x128xf32>
    %15 = arith.addf %12, %14 : vector<8x128xf32>
    %16 = vector.extract_strided_slice %15 {offsets = [0, 0], sizes = [8, 32], strides = [1, 1]} : vector<8x128xf32> to vector<8x32xf32>
    %17 = arith.negf %16 : vector<8x32xf32>
    %18 = math.exp %17 : vector<8x32xf32>
    %cst_10 = arith.constant 1.000000e+00 : f32
    %19 = vector.broadcast %cst_10 : f32 to vector<8x32xf32>
    %20 = arith.addf %19, %18 : vector<8x32xf32>
    %21 = arith.divf %19, %20 : vector<8x32xf32>
    %22 = vector.extract_strided_slice %15 {offsets = [0, 32], sizes = [8, 32], strides = [1, 1]} : vector<8x128xf32> to vector<8x32xf32>
    %23 = arith.negf %22 : vector<8x32xf32>
    %24 = math.exp %23 : vector<8x32xf32>
    %cst_11 = arith.constant 1.000000e+00 : f32
    %25 = vector.broadcast %cst_11 : f32 to vector<8x32xf32>
    %26 = arith.addf %25, %24 : vector<8x32xf32>
    %27 = arith.divf %25, %26 : vector<8x32xf32>
    %28 = vector.extract_strided_slice %15 {offsets = [0, 64], sizes = [8, 32], strides = [1, 1]} : vector<8x128xf32> to vector<8x32xf32>
    %29 = math.tanh %28 : vector<8x32xf32>
    %30 = vector.extract_strided_slice %15 {offsets = [0, 96], sizes = [8, 32], strides = [1, 1]} : vector<8x128xf32> to vector<8x32xf32>
    %31 = arith.negf %30 : vector<8x32xf32>
    %32 = math.exp %31 : vector<8x32xf32>
    %cst_12 = arith.constant 1.000000e+00 : f32
    %33 = vector.broadcast %cst_12 : f32 to vector<8x32xf32>
    %34 = arith.addf %33, %32 : vector<8x32xf32>
    %35 = arith.divf %33, %34 : vector<8x32xf32>
    %36 = arith.mulf %27, %11 : vector<8x32xf32>
    %37 = arith.mulf %21, %29 : vector<8x32xf32>
    %38 = arith.addf %36, %37 : vector<8x32xf32>
    %39 = math.tanh %38 : vector<8x32xf32>
    %40 = arith.mulf %35, %39 : vector<8x32xf32>
    %41 = vector.extract_strided_slice %7 {offsets = [8, 0], sizes = [8, 128], strides = [1, 1]} : vector<64x128xf32> to vector<8x128xf32>
    %42 = arith.truncf %40 : vector<8x32xf32> to vector<8x32xbf16>
    %cst_13 = arith.constant dense<0.000000e+00> : vector<8x128xf32>
    %43 = tpu.matmul %42, %9, %cst_13 {dimension_numbers = #tpu.dot_dimension_numbers<[1], [0], [0], [1], [0, 0, 1, 1], [], []>} : vector<8x32xbf16>, vector<32x128xbf16>, vector<8x128xf32> -> vector<8x128xf32>
    %44 = arith.addf %41, %43 : vector<8x128xf32>
    %45 = vector.extract_strided_slice %44 {offsets = [0, 0], sizes = [8, 32], strides = [1, 1]} : vector<8x128xf32> to vector<8x32xf32>
    %46 = arith.negf %45 : vector<8x32xf32>
    %47 = math.exp %46 : vector<8x32xf32>
    %cst_14 = arith.constant 1.000000e+00 : f32
    %48 = vector.broadcast %cst_14 : f32 to vector<8x32xf32>
    %49 = arith.addf %48, %47 : vector<8x32xf32>
    %50 = arith.divf %48, %49 : vector<8x32xf32>
    %51 = vector.extract_strided_slice %44 {offsets = [0, 32], sizes = [8, 32], strides = [1, 1]} : vector<8x128xf32> to vector<8x32xf32>
    %52 = arith.negf %51 : vector<8x32xf32>
    %53 = math.exp %52 : vector<8x32xf32>
    %cst_15 = arith.constant 1.000000e+00 : f32
    %54 = vector.broadcast %cst_15 : f32 to vector<8x32xf32>
    %55 = arith.addf %54, %53 : vector<8x32xf32>
    %56 = arith.divf %54, %55 : vector<8x32xf32>
    %57 = vector.extract_strided_slice %44 {offsets = [0, 64], sizes = [8, 32], strides = [1, 1]} : vector<8x128xf32> to vector<8x32xf32>
    %58 = math.tanh %57 : vector<8x32xf32>
    %59 = vector.extract_strided_slice %44 {offsets = [0, 96], sizes = [8, 32], strides = [1, 1]} : vector<8x128xf32> to vector<8x32xf32>
    %60 = arith.negf %59 : vector<8x32xf32>
    %61 = math.exp %60 : vector<8x32xf32>
    %cst_16 = arith.constant 1.000000e+00 : f32
    %62 = vector.broadcast %cst_16 : f32 to vector<8x32xf32>
    %63 = arith.addf %62, %61 : vector<8x32xf32>
    %64 = arith.divf %62, %63 : vector<8x32xf32>
    %65 = arith.mulf %56, %38 : vector<8x32xf32>
    %66 = arith.mulf %50, %58 : vector<8x32xf32>
    %67 = arith.addf %65, %66 : vector<8x32xf32>
    %68 = math.tanh %67 : vector<8x32xf32>
    %69 = arith.mulf %64, %68 : vector<8x32xf32>
    %70 = vector.extract_strided_slice %7 {offsets = [16, 0], sizes = [8, 128], strides = [1, 1]} : vector<64x128xf32> to vector<8x128xf32>
    %71 = arith.truncf %69 : vector<8x32xf32> to vector<8x32xbf16>
    %cst_17 = arith.constant dense<0.000000e+00> : vector<8x128xf32>
    %72 = tpu.matmul %71, %9, %cst_17 {dimension_numbers = #tpu.dot_dimension_numbers<[1], [0], [0], [1], [0, 0, 1, 1], [], []>} : vector<8x32xbf16>, vector<32x128xbf16>, vector<8x128xf32> -> vector<8x128xf32>
    %73 = arith.addf %70, %72 : vector<8x128xf32>
    %74 = vector.extract_strided_slice %73 {offsets = [0, 0], sizes = [8, 32], strides = [1, 1]} : vector<8x128xf32> to vector<8x32xf32>
    %75 = arith.negf %74 : vector<8x32xf32>
    %76 = math.exp %75 : vector<8x32xf32>
    %cst_18 = arith.constant 1.000000e+00 : f32
    %77 = vector.broadcast %cst_18 : f32 to vector<8x32xf32>
    %78 = arith.addf %77, %76 : vector<8x32xf32>
    %79 = arith.divf %77, %78 : vector<8x32xf32>
    %80 = vector.extract_strided_slice %73 {offsets = [0, 32], sizes = [8, 32], strides = [1, 1]} : vector<8x128xf32> to vector<8x32xf32>
    %81 = arith.negf %80 : vector<8x32xf32>
    %82 = math.exp %81 : vector<8x32xf32>
    %cst_19 = arith.constant 1.000000e+00 : f32
    %83 = vector.broadcast %cst_19 : f32 to vector<8x32xf32>
    %84 = arith.addf %83, %82 : vector<8x32xf32>
    %85 = arith.divf %83, %84 : vector<8x32xf32>
    %86 = vector.extract_strided_slice %73 {offsets = [0, 64], sizes = [8, 32], strides = [1, 1]} : vector<8x128xf32> to vector<8x32xf32>
    %87 = math.tanh %86 : vector<8x32xf32>
    %88 = vector.extract_strided_slice %73 {offsets = [0, 96], sizes = [8, 32], strides = [1, 1]} : vector<8x128xf32> to vector<8x32xf32>
    %89 = arith.negf %88 : vector<8x32xf32>
    %90 = math.exp %89 : vector<8x32xf32>
    %cst_20 = arith.constant 1.000000e+00 : f32
    %91 = vector.broadcast %cst_20 : f32 to vector<8x32xf32>
    %92 = arith.addf %91, %90 : vector<8x32xf32>
    %93 = arith.divf %91, %92 : vector<8x32xf32>
    %94 = arith.mulf %85, %67 : vector<8x32xf32>
    %95 = arith.mulf %79, %87 : vector<8x32xf32>
    %96 = arith.addf %94, %95 : vector<8x32xf32>
    %97 = math.tanh %96 : vector<8x32xf32>
    %98 = arith.mulf %93, %97 : vector<8x32xf32>
    %99 = vector.extract_strided_slice %7 {offsets = [24, 0], sizes = [8, 128], strides = [1, 1]} : vector<64x128xf32> to vector<8x128xf32>
    %100 = arith.truncf %98 : vector<8x32xf32> to vector<8x32xbf16>
    %cst_21 = arith.constant dense<0.000000e+00> : vector<8x128xf32>
    %101 = tpu.matmul %100, %9, %cst_21 {dimension_numbers = #tpu.dot_dimension_numbers<[1], [0], [0], [1], [0, 0, 1, 1], [], []>} : vector<8x32xbf16>, vector<32x128xbf16>, vector<8x128xf32> -> vector<8x128xf32>
    %102 = arith.addf %99, %101 : vector<8x128xf32>
    %103 = vector.extract_strided_slice %102 {offsets = [0, 0], sizes = [8, 32], strides = [1, 1]} : vector<8x128xf32> to vector<8x32xf32>
    %104 = arith.negf %103 : vector<8x32xf32>
    %105 = math.exp %104 : vector<8x32xf32>
    %cst_22 = arith.constant 1.000000e+00 : f32
    %106 = vector.broadcast %cst_22 : f32 to vector<8x32xf32>
    %107 = arith.addf %106, %105 : vector<8x32xf32>
    %108 = arith.divf %106, %107 : vector<8x32xf32>
    %109 = vector.extract_strided_slice %102 {offsets = [0, 32], sizes = [8, 32], strides = [1, 1]} : vector<8x128xf32> to vector<8x32xf32>
    %110 = arith.negf %109 : vector<8x32xf32>
    %111 = math.exp %110 : vector<8x32xf32>
    %cst_23 = arith.constant 1.000000e+00 : f32
    %112 = vector.broadcast %cst_23 : f32 to vector<8x32xf32>
    %113 = arith.addf %112, %111 : vector<8x32xf32>
    %114 = arith.divf %112, %113 : vector<8x32xf32>
    %115 = vector.extract_strided_slice %102 {offsets = [0, 64], sizes = [8, 32], strides = [1, 1]} : vector<8x128xf32> to vector<8x32xf32>
    %116 = math.tanh %115 : vector<8x32xf32>
    %117 = vector.extract_strided_slice %102 {offsets = [0, 96], sizes = [8, 32], strides = [1, 1]} : vector<8x128xf32> to vector<8x32xf32>
    %118 = arith.negf %117 : vector<8x32xf32>
    %119 = math.exp %118 : vector<8x32xf32>
    %cst_24 = arith.constant 1.000000e+00 : f32
    %120 = vector.broadcast %cst_24 : f32 to vector<8x32xf32>
    %121 = arith.addf %120, %119 : vector<8x32xf32>
    %122 = arith.divf %120, %121 : vector<8x32xf32>
    %123 = arith.mulf %114, %96 : vector<8x32xf32>
    %124 = arith.mulf %108, %116 : vector<8x32xf32>
    %125 = arith.addf %123, %124 : vector<8x32xf32>
    %126 = math.tanh %125 : vector<8x32xf32>
    %127 = arith.mulf %122, %126 : vector<8x32xf32>
    %128 = vector.extract_strided_slice %7 {offsets = [32, 0], sizes = [8, 128], strides = [1, 1]} : vector<64x128xf32> to vector<8x128xf32>
    %129 = arith.truncf %127 : vector<8x32xf32> to vector<8x32xbf16>
    %cst_25 = arith.constant dense<0.000000e+00> : vector<8x128xf32>
    %130 = tpu.matmul %129, %9, %cst_25 {dimension_numbers = #tpu.dot_dimension_numbers<[1], [0], [0], [1], [0, 0, 1, 1], [], []>} : vector<8x32xbf16>, vector<32x128xbf16>, vector<8x128xf32> -> vector<8x128xf32>
    %131 = arith.addf %128, %130 : vector<8x128xf32>
    %132 = vector.extract_strided_slice %131 {offsets = [0, 0], sizes = [8, 32], strides = [1, 1]} : vector<8x128xf32> to vector<8x32xf32>
    %133 = arith.negf %132 : vector<8x32xf32>
    %134 = math.exp %133 : vector<8x32xf32>
    %cst_26 = arith.constant 1.000000e+00 : f32
    %135 = vector.broadcast %cst_26 : f32 to vector<8x32xf32>
    %136 = arith.addf %135, %134 : vector<8x32xf32>
    %137 = arith.divf %135, %136 : vector<8x32xf32>
    %138 = vector.extract_strided_slice %131 {offsets = [0, 32], sizes = [8, 32], strides = [1, 1]} : vector<8x128xf32> to vector<8x32xf32>
    %139 = arith.negf %138 : vector<8x32xf32>
    %140 = math.exp %139 : vector<8x32xf32>
    %cst_27 = arith.constant 1.000000e+00 : f32
    %141 = vector.broadcast %cst_27 : f32 to vector<8x32xf32>
    %142 = arith.addf %141, %140 : vector<8x32xf32>
    %143 = arith.divf %141, %142 : vector<8x32xf32>
    %144 = vector.extract_strided_slice %131 {offsets = [0, 64], sizes = [8, 32], strides = [1, 1]} : vector<8x128xf32> to vector<8x32xf32>
    %145 = math.tanh %144 : vector<8x32xf32>
    %146 = vector.extract_strided_slice %131 {offsets = [0, 96], sizes = [8, 32], strides = [1, 1]} : vector<8x128xf32> to vector<8x32xf32>
    %147 = arith.negf %146 : vector<8x32xf32>
    %148 = math.exp %147 : vector<8x32xf32>
    %cst_28 = arith.constant 1.000000e+00 : f32
    %149 = vector.broadcast %cst_28 : f32 to vector<8x32xf32>
    %150 = arith.addf %149, %148 : vector<8x32xf32>
    %151 = arith.divf %149, %150 : vector<8x32xf32>
    %152 = arith.mulf %143, %125 : vector<8x32xf32>
    %153 = arith.mulf %137, %145 : vector<8x32xf32>
    %154 = arith.addf %152, %153 : vector<8x32xf32>
    %155 = math.tanh %154 : vector<8x32xf32>
    %156 = arith.mulf %151, %155 : vector<8x32xf32>
    %157 = vector.extract_strided_slice %7 {offsets = [40, 0], sizes = [8, 128], strides = [1, 1]} : vector<64x128xf32> to vector<8x128xf32>
    %158 = arith.truncf %156 : vector<8x32xf32> to vector<8x32xbf16>
    %cst_29 = arith.constant dense<0.000000e+00> : vector<8x128xf32>
    %159 = tpu.matmul %158, %9, %cst_29 {dimension_numbers = #tpu.dot_dimension_numbers<[1], [0], [0], [1], [0, 0, 1, 1], [], []>} : vector<8x32xbf16>, vector<32x128xbf16>, vector<8x128xf32> -> vector<8x128xf32>
    %160 = arith.addf %157, %159 : vector<8x128xf32>
    %161 = vector.extract_strided_slice %160 {offsets = [0, 0], sizes = [8, 32], strides = [1, 1]} : vector<8x128xf32> to vector<8x32xf32>
    %162 = arith.negf %161 : vector<8x32xf32>
    %163 = math.exp %162 : vector<8x32xf32>
    %cst_30 = arith.constant 1.000000e+00 : f32
    %164 = vector.broadcast %cst_30 : f32 to vector<8x32xf32>
    %165 = arith.addf %164, %163 : vector<8x32xf32>
    %166 = arith.divf %164, %165 : vector<8x32xf32>
    %167 = vector.extract_strided_slice %160 {offsets = [0, 32], sizes = [8, 32], strides = [1, 1]} : vector<8x128xf32> to vector<8x32xf32>
    %168 = arith.negf %167 : vector<8x32xf32>
    %169 = math.exp %168 : vector<8x32xf32>
    %cst_31 = arith.constant 1.000000e+00 : f32
    %170 = vector.broadcast %cst_31 : f32 to vector<8x32xf32>
    %171 = arith.addf %170, %169 : vector<8x32xf32>
    %172 = arith.divf %170, %171 : vector<8x32xf32>
    %173 = vector.extract_strided_slice %160 {offsets = [0, 64], sizes = [8, 32], strides = [1, 1]} : vector<8x128xf32> to vector<8x32xf32>
    %174 = math.tanh %173 : vector<8x32xf32>
    %175 = vector.extract_strided_slice %160 {offsets = [0, 96], sizes = [8, 32], strides = [1, 1]} : vector<8x128xf32> to vector<8x32xf32>
    %176 = arith.negf %175 : vector<8x32xf32>
    %177 = math.exp %176 : vector<8x32xf32>
    %cst_32 = arith.constant 1.000000e+00 : f32
    %178 = vector.broadcast %cst_32 : f32 to vector<8x32xf32>
    %179 = arith.addf %178, %177 : vector<8x32xf32>
    %180 = arith.divf %178, %179 : vector<8x32xf32>
    %181 = arith.mulf %172, %154 : vector<8x32xf32>
    %182 = arith.mulf %166, %174 : vector<8x32xf32>
    %183 = arith.addf %181, %182 : vector<8x32xf32>
    %184 = math.tanh %183 : vector<8x32xf32>
    %185 = arith.mulf %180, %184 : vector<8x32xf32>
    %186 = vector.extract_strided_slice %7 {offsets = [48, 0], sizes = [8, 128], strides = [1, 1]} : vector<64x128xf32> to vector<8x128xf32>
    %187 = arith.truncf %185 : vector<8x32xf32> to vector<8x32xbf16>
    %cst_33 = arith.constant dense<0.000000e+00> : vector<8x128xf32>
    %188 = tpu.matmul %187, %9, %cst_33 {dimension_numbers = #tpu.dot_dimension_numbers<[1], [0], [0], [1], [0, 0, 1, 1], [], []>} : vector<8x32xbf16>, vector<32x128xbf16>, vector<8x128xf32> -> vector<8x128xf32>
    %189 = arith.addf %186, %188 : vector<8x128xf32>
    %190 = vector.extract_strided_slice %189 {offsets = [0, 0], sizes = [8, 32], strides = [1, 1]} : vector<8x128xf32> to vector<8x32xf32>
    %191 = arith.negf %190 : vector<8x32xf32>
    %192 = math.exp %191 : vector<8x32xf32>
    %cst_34 = arith.constant 1.000000e+00 : f32
    %193 = vector.broadcast %cst_34 : f32 to vector<8x32xf32>
    %194 = arith.addf %193, %192 : vector<8x32xf32>
    %195 = arith.divf %193, %194 : vector<8x32xf32>
    %196 = vector.extract_strided_slice %189 {offsets = [0, 32], sizes = [8, 32], strides = [1, 1]} : vector<8x128xf32> to vector<8x32xf32>
    %197 = arith.negf %196 : vector<8x32xf32>
    %198 = math.exp %197 : vector<8x32xf32>
    %cst_35 = arith.constant 1.000000e+00 : f32
    %199 = vector.broadcast %cst_35 : f32 to vector<8x32xf32>
    %200 = arith.addf %199, %198 : vector<8x32xf32>
    %201 = arith.divf %199, %200 : vector<8x32xf32>
    %202 = vector.extract_strided_slice %189 {offsets = [0, 64], sizes = [8, 32], strides = [1, 1]} : vector<8x128xf32> to vector<8x32xf32>
    %203 = math.tanh %202 : vector<8x32xf32>
    %204 = vector.extract_strided_slice %189 {offsets = [0, 96], sizes = [8, 32], strides = [1, 1]} : vector<8x128xf32> to vector<8x32xf32>
    %205 = arith.negf %204 : vector<8x32xf32>
    %206 = math.exp %205 : vector<8x32xf32>
    %cst_36 = arith.constant 1.000000e+00 : f32
    %207 = vector.broadcast %cst_36 : f32 to vector<8x32xf32>
    %208 = arith.addf %207, %206 : vector<8x32xf32>
    %209 = arith.divf %207, %208 : vector<8x32xf32>
    %210 = arith.mulf %201, %183 : vector<8x32xf32>
    %211 = arith.mulf %195, %203 : vector<8x32xf32>
    %212 = arith.addf %210, %211 : vector<8x32xf32>
    %213 = math.tanh %212 : vector<8x32xf32>
    %214 = arith.mulf %209, %213 : vector<8x32xf32>
    %215 = vector.extract_strided_slice %7 {offsets = [56, 0], sizes = [8, 128], strides = [1, 1]} : vector<64x128xf32> to vector<8x128xf32>
    %216 = arith.truncf %214 : vector<8x32xf32> to vector<8x32xbf16>
    %cst_37 = arith.constant dense<0.000000e+00> : vector<8x128xf32>
    %217 = tpu.matmul %216, %9, %cst_37 {dimension_numbers = #tpu.dot_dimension_numbers<[1], [0], [0], [1], [0, 0, 1, 1], [], []>} : vector<8x32xbf16>, vector<32x128xbf16>, vector<8x128xf32> -> vector<8x128xf32>
    %218 = arith.addf %215, %217 : vector<8x128xf32>
    %219 = vector.extract_strided_slice %218 {offsets = [0, 0], sizes = [8, 32], strides = [1, 1]} : vector<8x128xf32> to vector<8x32xf32>
    %220 = arith.negf %219 : vector<8x32xf32>
    %221 = math.exp %220 : vector<8x32xf32>
    %cst_38 = arith.constant 1.000000e+00 : f32
    %222 = vector.broadcast %cst_38 : f32 to vector<8x32xf32>
    %223 = arith.addf %222, %221 : vector<8x32xf32>
    %224 = arith.divf %222, %223 : vector<8x32xf32>
    %225 = vector.extract_strided_slice %218 {offsets = [0, 32], sizes = [8, 32], strides = [1, 1]} : vector<8x128xf32> to vector<8x32xf32>
    %226 = arith.negf %225 : vector<8x32xf32>
    %227 = math.exp %226 : vector<8x32xf32>
    %cst_39 = arith.constant 1.000000e+00 : f32
    %228 = vector.broadcast %cst_39 : f32 to vector<8x32xf32>
    %229 = arith.addf %228, %227 : vector<8x32xf32>
    %230 = arith.divf %228, %229 : vector<8x32xf32>
    %231 = vector.extract_strided_slice %218 {offsets = [0, 64], sizes = [8, 32], strides = [1, 1]} : vector<8x128xf32> to vector<8x32xf32>
    %232 = math.tanh %231 : vector<8x32xf32>
    %233 = vector.extract_strided_slice %218 {offsets = [0, 96], sizes = [8, 32], strides = [1, 1]} : vector<8x128xf32> to vector<8x32xf32>
    %234 = arith.negf %233 : vector<8x32xf32>
    %235 = math.exp %234 : vector<8x32xf32>
    %cst_40 = arith.constant 1.000000e+00 : f32
    %236 = vector.broadcast %cst_40 : f32 to vector<8x32xf32>
    %237 = arith.addf %236, %235 : vector<8x32xf32>
    %238 = arith.divf %236, %237 : vector<8x32xf32>
    %239 = arith.mulf %230, %212 : vector<8x32xf32>
    %240 = arith.mulf %224, %232 : vector<8x32xf32>
    %241 = arith.addf %239, %240 : vector<8x32xf32>
    %242 = math.tanh %241 : vector<8x32xf32>
    %243 = arith.mulf %238, %242 : vector<8x32xf32>
    %c0_41 = arith.constant 0 : index
    %c0_42 = arith.constant 0 : index
    %244 = vector.load %arg4[%c0_41, %c0_42] : memref<32x8xf32, #tpu.memory_space<vmem>>, vector<32x8xf32>
    %cst_43 = arith.constant dense<0.000000e+00> : vector<8x8xf32>
    %245 = tpu.matmul %243, %244, %cst_43 {dimension_numbers = #tpu.dot_dimension_numbers<[1], [0], [0], [1], [0, 0, 1, 1], [], []>} : vector<8x32xf32>, vector<32x8xf32>, vector<8x8xf32> -> vector<8x8xf32>
    %c0_44 = arith.constant 0 : index
    %c0_45 = arith.constant 0 : index
    %246 = vector.load %arg5[%c0_44, %c0_45] : memref<1x8xf32, #tpu.memory_space<vmem>>, vector<1x8xf32>
    %247 = vector.broadcast %246 : vector<1x8xf32> to vector<8x8xf32>
    %248 = arith.addf %245, %247 : vector<8x8xf32>
    %c0_46 = arith.constant 0 : index
    %c0_47 = arith.constant 0 : index
    %249 = vector.load %arg6[%c0_46, %c0_47] : memref<8x8xf32, #tpu.memory_space<vmem>>, vector<8x8xf32>
    tpu.vector_store %arg6[%c0_46, %c0_47], %248 {strides = array<i32>} : memref<8x8xf32, #tpu.memory_space<vmem>>, vector<8x8xf32>,
    return
  }
}

</mosaic_0001>

<bundles_post_ra>
// kernel: complete_model_forward.1
= control target key start
LH: loop header
LB: loop body
LE: loop exit
PB: predicated region body
PF: predicated region fallthrough
CT: control target
= control target key end

     0   :  { %v1048_v3 = vmov 0.0   ;;  %vm1049_vm0 = vmmov 0   ;;  %vm47_vm1 = vcmask 130048   ;;  %s1288_s0 = inlined_call_operand.vmem [shape: f32[64,16], index: 0, kind: input, shape index: {}]   ;;  %s1289_s1 = inlined_call_operand.vmem [shape: f32[16,128], index: 1, kind: input, shape index: {}]   ;;  %s1290_s2 = inlined_call_operand.vmem [shape: f32[32,128], index: 2, kind: input, shape index: {}]   ;;  %s1291_s3 = inlined_call_operand.vmem [shape: f32[1,128], index: 3, kind: input, shape index: {}]   ;;  %s1292_s4 = inlined_call_operand.vmem [shape: f32[32,8], index: 4, kind: input, shape index: {}]   ;;  %s1293_s5 = inlined_call_operand.vmem [shape: f32[1,8], index: 5, kind: input, shape index: {}]   ;;  %s1294_s6 = inlined_call_operand.hbm [shape: f32[8,8], index: 6, kind: output, shape index: {}]  }
   0x1   :  { %v37_v0 = vld [vmem:[%s1289_s1] sm:$0xff]  ;;  %v38_v1 = vld [vmem:[%s1289_s1 + $0x8] sm:$0xff]  ;;  %872 = vmatprep.subr.bf16.mxu1 %v1048_v3  ;;  %876 = vmatprep.mubr.msk.bf16.mxu1 %vm1049_vm0, %v1048_v3  ;;  %v27_v10 = vld [vmem:[%s1288_s0 + $0x10] sm:$0xff] }
   0x2   :  { %v125_v2 = vld [vmem:[%s1290_s2] sm:$0xff]  ;;  %v39_v4 = vpack.c.bf16 %v38_v1, %v37_v0  ;;  %v126_v5 = vld [vmem:[%s1290_s2 + $0x8] sm:$0xff]  ;;  %v28_v11 = vld [vmem:[%s1288_s0 + $0x18] sm:$0xff] }
   0x3   :  { %v25_v6 = vld [vmem:[%s1288_s0] sm:$0xff]  ;;  %v26_v7 = vld [vmem:[%s1288_s0 + $0x8] sm:$0xff]  ;;  %v1111_v8 = vpack.c.bf16 %v126_v5, %v125_v2  ;;  %v127_v12 = vld [vmem:[%s1290_s2 + $0x10] sm:$0xff]  ;;  %v34_v13 = vpack.c.bf16 %v28_v11, %v27_v10 }
   0x4   :  { %v33_v9 = vpack.c.bf16 %v26_v7, %v25_v6  ;;  %862 = vmatprep.subr.bf16.mxu0 %v39_v4  ;;  %v128_v14 = vld [vmem:[%s1290_s2 + $0x18] sm:$0xff] }
   0x5   :  { %11 = vsyncpa [#allocation3], 0  ;;  %873 = vmatpush3.bf16.msra.mxu1 %v1111_v8  ;;  %863 = vmatpush3.bf16.msra.mxu0 %v39_v4  ;;  %v1126_v15 = vpack.c.bf16 %v128_v14, %v127_v12  ;;  %v1050_v16 = vmov 0   ;;  %v1147_v17 = vld [vmem:[%s1291_s3] ss:$0 sm:$0xff]  ;;  %s1051_s17 = smov 64  }
   0x6   :  { %864 = vmatprep.mubr.msk.bf16.mxu0 %vm47_vm1, %v33_v9  ;;  %874 = vmatprep.subr.bf16.mxu1 %v1048_v3  ;;  %s1052_s3 = smov 32   ;;  %vm131_vm2 = vcmask 261120   ;;  %v29_v59 = vld [vmem:[%s1288_s0 + $0x20] sm:$0xff]  ;;  %v30_v60 = vld [vmem:[%s1288_s0 + $0x28] sm:$0xff]  ;;  %v31_v61 = vld [vmem:[%s1288_s0 + $0x30] sm:$0xff]  ;;  %s1054_s10 = smov [#allocation2]  }
   0x7   :  { %888 = vmatprep.subr.bf16.mxu0 %v1048_v3  ;;  %v35_v62 = vpack.c.bf16 %v30_v60, %v29_v59  ;;  %v32_v63 = vld [vmem:[%s1288_s0 + $0x38] sm:$0xff]  ;;  %vm790_vm3 = vcmask 64512  }
   0x8   :  { %865 = vmatmul.mubr.msk.bf16.vlgmr.msra.gmra.mrb[0].mxu0 %vm47_vm1, %v34_v13  ;;  %v36_v0 = vpack.c.bf16 %v32_v63, %v31_v61 }
   0x9   :  { %875 = vmatpush3.bf16.msra.mxu1 %v1126_v15  ;;  %889 = vmatpush3.bf16.msra.mxu0 %v1111_v8 }
   0xa   :  { %880 = vmatprep.subr.bf16.mxu1 %v1048_v3  ;;  %890 = vmatprep.subr.bf16.mxu0 %v1048_v3 }
   0xb   :  { %868 = vmatprep.mubr.msk.bf16.mxu0 %vm47_vm1, %v35_v62 }
   0xc   :  { %877 = vmatmul.mubr.bf16.vlgmr.msra.gmra.mrb[0].mxu1 %v1050_v16 }
   0xd   :  { %881 = vmatpush3.bf16.msra.mxu1 %v1111_v8  ;;  %884 = vmatprep.mubr.msk.bf16.mxu1 %vm1049_vm0, %v1048_v3 }
   0xe   :  { %882 = vmatprep.subr.bf16.mxu1 %v1048_v3  ;;  %891 = vmatpush3.bf16.msra.mxu0 %v1126_v15 }
   0xf   :  { %904 = vmatprep.subr.bf16.mxu0 %v1048_v3 }
  0x10   :  { %869 = vmatmul.mubr.msk.bf16.gmra.mrb[4].mxu0 %vm47_vm1, %v36_v0 }
  0x11   :  { %883 = vmatpush3.bf16.msra.mxu1 %v1126_v15  ;;  %892 = vmatprep.mubr.msk.bf16.mxu0 %vm1049_vm0, %v1048_v3 }
  0x12   :  { %896 = vmatprep.subr.bf16.mxu1 %v1048_v3 }
  0xdb   :  { %v1149_v18 = vpop.f32.mrb[0].mxu0 }
  0xdc   :  { %v94_v19 = vpop.f32.mrb[1].mxu0  ;;  %v103_v12 = vadd.f32 %v1149_v18, %v1147_v17 }
  0xdd   :  { %v95_v20 = vadd.f32 %v1147_v17, %v94_v19  ;;  %v1152_v21 = vpop.f32.mrb[2].mxu0 }
  0xde   :  { %v97_v22 = vpop.f32.mrb[3].mxu0 }
  0xdf   :  { %v169_v23 = vpop.f32.mrb[0].mxu1  ;;  %v98_v43 = vadd.f32 %v1147_v17, %v97_v22 }
  0xe0   :  { %v175_v24 = vadd.f32 %v169_v23, %v95_v20  ;;  %v878_v25 = vpop.f32.mrb[1].mxu1 }
  0xe1   :  { %v172_v26 = vpop.f32.mrb[2].mxu1 }
  0xe2   :  { %960 = vtanh.f32 %v175_v24  ;;  %v879_v27 = vpop.f32.mrb[3].mxu1  ;;  %v811_v29 = vmul.f32 -1.442695, %v175_v24 }
  0xe3   :  { %v1186_v6 = vpop.f32.mrb[4].mxu0 }
  0xe4   :  { %962 = vpow2.f32 %v811_v29  ;;  %v1188_v7 = vpop.f32.mrb[5].mxu0 }
  0xe5   :  { %v1190_v9 = vpop.f32.mrb[6].mxu0 }
  0xe6   :  { %v1192_v10 = vpop.f32.mrb[7].mxu0 }
  0xec   :  { %v961_v28 = vpop.eup %960 }
  0xed   :  { %185 = vrot.lane.b32.xlu0 %v961_v28, %s1051_s17 }
  0xee   :  { %v963_v30 = vpop.eup %962 }
  0xef   :  { %v179_v31 = vadd.f32 1.0, %v963_v30 }
  0xf1   :  { %964 = vrcp.f32 %v179_v31 }
  0xfb   :  { %v965_v32 = vpop.eup %964 }
  0xfc   :  { %v183_v35 = vmul.f32 0.0, %v965_v32 }
 0x15f   :  { %v186_v33 = vpop.permute.xlu0 %185 }
 0x160   :  { %v188_v34 = vmul.f32 %v965_v32, %v186_v33 }
 0x162   :  { %190 = vrot.lane.b32.xlu0 %v188_v34, %s1052_s3 }
 0x1d4   :  { %v191_v36 = vpop.permute.xlu0 %190 }
 0x1d5   :  { %v193_v37 = vadd.f32 %v191_v36, %v183_v35  ;;  %v106_v36 = vadd.f32 %v1152_v21, %v1147_v17 }
 0x1d7   :  { %966 = vtanh.f32 %v193_v37 }
 0x1e1   :  { %v967_v38 = vpop.eup %966 }
 0x1e2   :  { %196 = vrot.lane.b32.xlu1 %v967_v38, %s1051_s17 }
 0x254   :  { %v197_v39 = vpop.permute.xlu1 %196 }
 0x255   :  { %v199_v40 = vmul.f32 %v965_v32, %v197_v39 }
 0x257   :  { %v200_v41 = vpack.c.bf16 %v199_v40, %v199_v40 }
 0x259   :  { %202 = vrot.lane.b32.xlu1 %v200_v41, %s1052_s3 }
 0x2cb   :  { %v203_v42 = vpop.permute.xlu1 %202 }
 0x2cc   :  { %885 = vmatmul.mubr.msk.bf16.vlgmr.msra.gmra.mrb[4].mxu1 %vm131_vm2, %v203_v42 }
 0x2cd   :  { %897 = vmatpush3.bf16.msra.mxu1 %v1111_v8  ;;  %900 = vmatprep.mubr.msk.bf16.mxu1 %vm1049_vm0, %v1048_v3 }
 0x2ce   :  { %898 = vmatprep.subr.bf16.mxu1 %v1048_v3 }
 0x2d1   :  { %899 = vmatpush3.bf16.msra.mxu1 %v1126_v15 }
 0x2d2   :  { %912 = vmatprep.subr.bf16.mxu1 %v1048_v3 }
 0x39f   :  { %v241_v44 = vpop.f32.mrb[4].mxu1 }
 0x3a0   :  { %v247_v45 = vadd.f32 %v241_v44, %v98_v43  ;;  %v886_v46 = vpop.f32.mrb[5].mxu1 }
 0x3a1   :  { %v244_v47 = vpop.f32.mrb[6].mxu1 }
 0x3a2   :  { %968 = vtanh.f32 %v247_v45  ;;  %v887_v48 = vpop.f32.mrb[7].mxu1  ;;  %v813_v50 = vmul.f32 -1.442695, %v247_v45 }
 0x3a4   :  { %970 = vpow2.f32 %v813_v50 }
 0x3ac   :  { %v969_v49 = vpop.eup %968 }
 0x3ad   :  { %257 = vrot.lane.b32.xlu0 %v969_v49, %s1051_s17 }
 0x3ae   :  { %v971_v51 = vpop.eup %970 }
 0x3af   :  { %v251_v52 = vadd.f32 1.0, %v971_v51 }
 0x3b1   :  { %972 = vrcp.f32 %v251_v52 }
 0x3bb   :  { %v973_v53 = vpop.eup %972 }
 0x3bc   :  { %v255_v56 = vmul.f32 %v973_v53, %v193_v37 }
 0x41f   :  { %v258_v54 = vpop.permute.xlu0 %257 }
 0x420   :  { %v260_v55 = vmul.f32 %v973_v53, %v258_v54 }
 0x422   :  { %262 = vrot.lane.b32.xlu1 %v260_v55, %s1052_s3 }
 0x494   :  { %v263_v57 = vpop.permute.xlu1 %262 }
 0x495   :  { %v265_v58 = vadd.f32 %v263_v57, %v255_v56  ;;  %v111_v56 = vadd.f32 %v1147_v17, %v1188_v7 }
 0x497   :  { %974 = vtanh.f32 %v265_v58 }
 0x4a1   :  { %v975_v1 = vpop.eup %974 }
 0x4a2   :  { %268 = vrot.lane.b32.xlu0 %v975_v1, %s1051_s17 }
 0x514   :  { %v269_v2 = vpop.permute.xlu0 %268 }
 0x515   :  { %v271_v4 = vmul.f32 %v973_v53, %v269_v2 }
 0x517   :  { %v272_v5 = vpack.c.bf16 %v271_v4, %v271_v4 }
 0x519   :  { %274 = vrot.lane.b32.xlu1 %v272_v5, %s1052_s3 }
 0x58b   :  { %v275_v11 = vpop.permute.xlu1 %274 }
 0x58c   :  { %893 = vmatmul.mubr.msk.bf16.vlgmr.msra.gmra.mrb[8].mxu0 %vm131_vm2, %v275_v11 }
 0x58d   :  { %905 = vmatpush3.bf16.msra.mxu0 %v1111_v8  ;;  %908 = vmatprep.mubr.msk.bf16.mxu0 %vm1049_vm0, %v1048_v3 }
 0x58e   :  { %906 = vmatprep.subr.bf16.mxu0 %v1048_v3 }
 0x591   :  { %907 = vmatpush3.bf16.msra.mxu0 %v1126_v15 }
 0x592   :  { %920 = vmatprep.subr.bf16.mxu0 %v1048_v3 }
 0x65f   :  { %v313_v13 = vpop.f32.mrb[8].mxu0 }
 0x660   :  { %v319_v14 = vadd.f32 %v313_v13, %v103_v12  ;;  %v894_v16 = vpop.f32.mrb[9].mxu0 }
 0x661   :  { %v316_v19 = vpop.f32.mrb[10].mxu0 }
 0x662   :  { %976 = vtanh.f32 %v319_v14  ;;  %v895_v20 = vpop.f32.mrb[11].mxu0  ;;  %v815_v23 = vmul.f32 -1.442695, %v319_v14 }
 0x664   :  { %978 = vpow2.f32 %v815_v23 }
 0x66c   :  { %v977_v22 = vpop.eup %976 }
 0x66d   :  { %329 = vrot.lane.b32.xlu0 %v977_v22, %s1051_s17  ;;  %v114_v22 = vadd.f32 %v1147_v17, %v1192_v10 }
 0x66e   :  { %v979_v24 = vpop.eup %978 }
 0x66f   :  { %v323_v25 = vadd.f32 1.0, %v979_v24 }
 0x671   :  { %980 = vrcp.f32 %v323_v25 }
 0x67b   :  { %v981_v26 = vpop.eup %980 }
 0x67c   :  { %v327_v18 = vmul.f32 %v981_v26, %v265_v58 }
 0x6df   :  { %v330_v27 = vpop.permute.xlu0 %329 }
 0x6e0   :  { %v332_v28 = vmul.f32 %v981_v26, %v330_v27 }
 0x6e2   :  { %334 = vrot.lane.b32.xlu1 %v332_v28, %s1052_s3 }
 0x754   :  { %v335_v29 = vpop.permute.xlu1 %334 }
 0x755   :  { %v337_v30 = vadd.f32 %v335_v29, %v327_v18 }
 0x757   :  { %982 = vtanh.f32 %v337_v30 }
 0x761   :  { %v983_v31 = vpop.eup %982 }
 0x762   :  { %340 = vrot.lane.b32.xlu0 %v983_v31, %s1051_s17 }
 0x7d4   :  { %v341_v32 = vpop.permute.xlu0 %340 }
 0x7d5   :  { %v343_v33 = vmul.f32 %v981_v26, %v341_v32 }
 0x7d7   :  { %v344_v34 = vpack.c.bf16 %v343_v33, %v343_v33 }
 0x7d9   :  { %346 = vrot.lane.b32.xlu1 %v344_v34, %s1052_s3 }
 0x84b   :  { %v347_v35 = vpop.permute.xlu1 %346 }
 0x84c   :  { %901 = vmatmul.mubr.msk.bf16.vlgmr.msra.gmra.mrb[8].mxu1 %vm131_vm2, %v347_v35 }
 0x84d   :  { %913 = vmatpush3.bf16.msra.mxu1 %v1111_v8  ;;  %916 = vmatprep.mubr.msk.bf16.mxu1 %vm1049_vm0, %v1048_v3 }
 0x84e   :  { %914 = vmatprep.subr.bf16.mxu1 %v1048_v3 }
 0x851   :  { %915 = vmatpush3.bf16.msra.mxu1 %v1126_v15 }
 0x852   :  { %928 = vmatprep.subr.bf16.mxu1 %v1048_v3 }
 0x91f   :  { %v385_v37 = vpop.f32.mrb[8].mxu1 }
 0x920   :  { %v391_v38 = vadd.f32 %v385_v37, %v106_v36  ;;  %v902_v39 = vpop.f32.mrb[9].mxu1 }
 0x921   :  { %v388_v40 = vpop.f32.mrb[10].mxu1  ;;  %v119_v39 = vadd.f32 %v1186_v6, %v1147_v17 }
 0x922   :  { %984 = vtanh.f32 %v391_v38  ;;  %v903_v41 = vpop.f32.mrb[11].mxu1  ;;  %v817_v43 = vmul.f32 -1.442695, %v391_v38 }
 0x924   :  { %986 = vpow2.f32 %v817_v43 }
 0x92c   :  { %v985_v42 = vpop.eup %984 }
 0x92d   :  { %401 = vrot.lane.b32.xlu0 %v985_v42, %s1051_s17 }
 0x92e   :  { %v987_v44 = vpop.eup %986 }
 0x92f   :  { %v395_v45 = vadd.f32 1.0, %v987_v44 }
 0x931   :  { %988 = vrcp.f32 %v395_v45 }
 0x93b   :  { %v989_v46 = vpop.eup %988 }
 0x93c   :  { %v399_v21 = vmul.f32 %v989_v46, %v337_v30 }
 0x99f   :  { %v402_v47 = vpop.permute.xlu0 %401 }
 0x9a0   :  { %v404_v48 = vmul.f32 %v989_v46, %v402_v47 }
 0x9a2   :  { %406 = vrot.lane.b32.xlu1 %v404_v48, %s1052_s3 }
 0xa14   :  { %v407_v49 = vpop.permute.xlu1 %406 }
 0xa15   :  { %v409_v50 = vadd.f32 %v407_v49, %v399_v21 }
 0xa17   :  { %990 = vtanh.f32 %v409_v50 }
 0xa21   :  { %v991_v51 = vpop.eup %990 }
 0xa22   :  { %412 = vrot.lane.b32.xlu0 %v991_v51, %s1051_s17 }
 0xa94   :  { %v413_v52 = vpop.permute.xlu0 %412 }
 0xa95   :  { %v415_v53 = vmul.f32 %v989_v46, %v413_v52 }
 0xa97   :  { %v416_v54 = vpack.c.bf16 %v415_v53, %v415_v53 }
 0xa99   :  { %418 = vrot.lane.b32.xlu1 %v416_v54, %s1052_s3 }
 0xb0b   :  { %v419_v55 = vpop.permute.xlu1 %418 }
 0xb0c   :  { %909 = vmatmul.mubr.msk.bf16.vlgmr.msra.gmra.mrb[12].mxu0 %vm131_vm2, %v419_v55 }
 0xb0d   :  { %921 = vmatpush3.bf16.msra.mxu0 %v1111_v8  ;;  %924 = vmatprep.mubr.msk.bf16.mxu0 %vm1049_vm0, %v1048_v3 }
 0xb0e   :  { %922 = vmatprep.subr.bf16.mxu0 %v1048_v3 }
 0xb11   :  { %923 = vmatpush3.bf16.msra.mxu0 %v1126_v15 }
 0xbdf   :  { %v457_v57 = vpop.f32.mrb[12].mxu0 }
 0xbe0   :  { %v463_v58 = vadd.f32 %v457_v57, %v111_v56  ;;  %v910_v59 = vpop.f32.mrb[13].mxu0  ;;  %v122_v57 = vadd.f32 %v1190_v9, %v1147_v17 }
 0xbe1   :  { %v460_v60 = vpop.f32.mrb[14].mxu0 }
 0xbe2   :  { %992 = vtanh.f32 %v463_v58  ;;  %v911_v61 = vpop.f32.mrb[15].mxu0  ;;  %v819_v63 = vmul.f32 -1.442695, %v463_v58 }
 0xbe4   :  { %994 = vpow2.f32 %v819_v63 }
 0xbec   :  { %v993_v62 = vpop.eup %992 }
 0xbed   :  { %473 = vrot.lane.b32.xlu0 %v993_v62, %s1051_s17 }
 0xbee   :  { %v995_v0 = vpop.eup %994 }
 0xbef   :  { %v467_v1 = vadd.f32 1.0, %v995_v0 }
 0xbf1   :  { %996 = vrcp.f32 %v467_v1 }
 0xbfb   :  { %v997_v2 = vpop.eup %996 }
 0xbfc   :  { %v471_v7 = vmul.f32 %v997_v2, %v409_v50 }
 0xc5f   :  { %v474_v4 = vpop.permute.xlu0 %473 }
 0xc60   :  { %v476_v5 = vmul.f32 %v997_v2, %v474_v4 }
 0xc62   :  { %478 = vrot.lane.b32.xlu1 %v476_v5, %s1052_s3 }
 0xcd4   :  { %v479_v11 = vpop.permute.xlu1 %478 }
 0xcd5   :  { %v481_v12 = vadd.f32 %v479_v11, %v471_v7 }
 0xcd7   :  { %998 = vtanh.f32 %v481_v12 }
 0xce1   :  { %v999_v13 = vpop.eup %998 }
 0xce2   :  { %484 = vrot.lane.b32.xlu0 %v999_v13, %s1051_s17  ;;  %v705_v13 = vld [vmem:[%s1292_s4 + $0x8] sm:$0xff] }
 0xd54   :  { %v485_v14 = vpop.permute.xlu0 %484 }
 0xd55   :  { %v487_v16 = vmul.f32 %v997_v2, %v485_v14  ;;  %v706_v14 = vld [vmem:[%s1292_s4 + $0x10] sm:$0xff] }
 0xd57   :  { %v488_v19 = vpack.c.bf16 %v487_v16, %v487_v16  ;;  %v1053_v16 = vmov 0.0|0.0  }
 0xd58   :  { %947 = vmatprep.subr.bf16.mxu0 %v1053_v16 }
 0xd59   :  { %490 = vrot.lane.b32.xlu1 %v488_v19, %s1052_s3 }
 0xdcb   :  { %v491_v20 = vpop.permute.xlu1 %490 }
 0xdcc   :  { %917 = vmatmul.mubr.msk.bf16.vlgmr.msra.gmra.mrb[12].mxu1 %vm131_vm2, %v491_v20  ;;  %v707_v20 = vld [vmem:[%s1292_s4 + $0x18] sm:$0xff] }
 0xdcd   :  { %929 = vmatpush3.bf16.msra.mxu1 %v1111_v8  ;;  %932 = vmatprep.mubr.msk.bf16.mxu1 %vm1049_vm0, %v1048_v3 }
 0xdce   :  { %930 = vmatprep.subr.bf16.mxu1 %v1048_v3 }
 0xdd1   :  { %931 = vmatpush3.bf16.msra.mxu1 %v1126_v15 }
 0xe9f   :  { %v529_v23 = vpop.f32.mrb[12].mxu1 }
 0xea0   :  { %v535_v24 = vadd.f32 %v529_v23, %v114_v22  ;;  %v918_v25 = vpop.f32.mrb[13].mxu1  ;;  %v951_v22 = vpack.c.bf16 %v707_v20, %v706_v14 }
 0xea1   :  { %v532_v26 = vpop.f32.mrb[14].mxu1 }
 0xea2   :  { %1000 = vtanh.f32 %v535_v24  ;;  %v919_v27 = vpop.f32.mrb[15].mxu1  ;;  %v821_v8 = vmul.f32 -1.442695, %v535_v24 }
 0xea3   :  { %v826_v27 = vld [vmem:[%s1293_s5] ss:$0 sm:$0xff] }
 0xea4   :  { %1002 = vpow2.f32 %v821_v8 }
 0xeac   :  { %v1001_v28 = vpop.eup %1000 }
 0xead   :  { %545 = vrot.lane.b32.xlu0 %v1001_v28, %s1051_s17 }
 0xeae   :  { %v1003_v18 = vpop.eup %1002 }
 0xeaf   :  { %v539_v29 = vadd.f32 1.0, %v1003_v18 }
 0xeb1   :  { %1004 = vrcp.f32 %v539_v29 }
 0xebb   :  { %v1005_v30 = vpop.eup %1004 }
 0xebc   :  { %v543_v10 = vmul.f32 %v1005_v30, %v481_v12  ;;  %v704_v12 = vld [vmem:[%s1292_s4] sm:$0xff]  ;;  %s798_s4 = sshll.u32 %s1054_s10, 4  ;;  %s799_s4 = int_to_ptr.vmem [resolvable:$true] %s798_s4 }
 0xebd   :  { %v948_v19 = vpack.c.bf16 %v705_v13, %v704_v12  ;;  %s1024_s11 = scalar_lea.vmem %s799_s4, 128  ;;  %p1029_p1 = scmp.lt.s32.totalorder %s799_s4, %s799_s4 }
 0xebe   :  { %p1025_p0 = scmp.ne.s32.totalorder %s799_s4, %s1024_s11  ;;  %p1030_p2 = scmp.lt.s32.totalorder %s1024_s11, %s1024_s11 }
 0xec0   :  { %p1031_p3 = por %p1030_p2, %p1029_p1 }
 0xec2   :  { %p1032_p4 = pnand %p1031_p3, %p1025_p0 }
 0xf1f   :  { %v546_v31 = vpop.permute.xlu0 %545 }
 0xf20   :  { %v548_v15 = vmul.f32 %v1005_v30, %v546_v31 }
 0xf22   :  { %550 = vrot.lane.b32.xlu1 %v548_v15, %s1052_s3 }
 0xf94   :  { %v551_v32 = vpop.permute.xlu1 %550 }
 0xf95   :  { %v553_v33 = vadd.f32 %v551_v32, %v543_v10 }
 0xf97   :  { %1006 = vtanh.f32 %v553_v33 }
 0xfa1   :  { %v1007_v34 = vpop.eup %1006 }
 0xfa2   :  { %556 = vrot.lane.b32.xlu0 %v1007_v34, %s1051_s17 }
0x1014   :  { %v557_v35 = vpop.permute.xlu0 %556 }
0x1015   :  { %v559_v36 = vmul.f32 %v1005_v30, %v557_v35 }
0x1017   :  { %v560_v37 = vpack.c.bf16 %v559_v36, %v559_v36 }
0x1019   :  { %562 = vrot.lane.b32.xlu1 %v560_v37, %s1052_s3 }
0x108b   :  { %v563_v38 = vpop.permute.xlu1 %562 }
0x108c   :  { %925 = vmatmul.mubr.msk.bf16.vlgmr.msra.gmra.mrb[16].mxu0 %vm131_vm2, %v563_v38 }
0x108d   :  { %944 = vmatprep.mubr.msk.f32.mxu0 %vm1049_vm0, %v1048_v3  ;;  %949 = vmatpush3.bf16.msra.mxu0 %v948_v19 }
0x108e   :  { %950 = vmatprep.subr.bf16.mxu0 %v1053_v16 }
0x1091   :  { %952 = vmatpush3.bf16.msra.mxu0 %v951_v22 }
0x115f   :  { %v601_v40 = vpop.f32.mrb[16].mxu0 }
0x1160   :  { %v607_v41 = vadd.f32 %v601_v40, %v119_v39  ;;  %v926_v42 = vpop.f32.mrb[17].mxu0 }
0x1161   :  { %v604_v43 = vpop.f32.mrb[18].mxu0 }
0x1162   :  { %1008 = vtanh.f32 %v607_v41  ;;  %v927_v44 = vpop.f32.mrb[19].mxu0  ;;  %v823_v46 = vmul.f32 -1.442695, %v607_v41 }
0x1164   :  { %1010 = vpow2.f32 %v823_v46 }
0x116c   :  { %v1009_v45 = vpop.eup %1008 }
0x116d   :  { %617 = vrot.lane.b32.xlu0 %v1009_v45, %s1051_s17 }
0x116e   :  { %v1011_v47 = vpop.eup %1010 }
0x116f   :  { %v611_v48 = vadd.f32 1.0, %v1011_v47 }
0x1171   :  { %1012 = vrcp.f32 %v611_v48 }
0x117b   :  { %v1013_v21 = vpop.eup %1012 }
0x117c   :  { %v615_v6 = vmul.f32 %v1013_v21, %v553_v33 }
0x11df   :  { %v618_v49 = vpop.permute.xlu0 %617 }
0x11e0   :  { %v620_v3 = vmul.f32 %v1013_v21, %v618_v49 }
0x11e2   :  { %622 = vrot.lane.b32.xlu1 %v620_v3, %s1052_s3 }
0x1254   :  { %v623_v50 = vpop.permute.xlu1 %622 }
0x1255   :  { %v625_v51 = vadd.f32 %v623_v50, %v615_v6 }
0x1257   :  { %1014 = vtanh.f32 %v625_v51 }
0x1261   :  { %v1015_v52 = vpop.eup %1014 }
0x1262   :  { %628 = vrot.lane.b32.xlu0 %v1015_v52, %s1051_s17 }
0x12d4   :  { %v629_v53 = vpop.permute.xlu0 %628 }
0x12d5   :  { %v631_v54 = vmul.f32 %v1013_v21, %v629_v53 }
0x12d7   :  { %v632_v55 = vpack.c.bf16 %v631_v54, %v631_v54 }
0x12d9   :  { %634 = vrot.lane.b32.xlu1 %v632_v55, %s1052_s3 }
0x134b   :  { %v635_v56 = vpop.permute.xlu1 %634 }
0x134c   :  { %933 = vmatmul.mubr.msk.bf16.vlgmr.msra.gmra.mrb[16].mxu1 %vm131_vm2, %v635_v56 }
0x141f   :  { %v673_v58 = vpop.f32.mrb[16].mxu1 }
0x1420   :  { %v679_v59 = vadd.f32 %v673_v58, %v122_v57  ;;  %v934_v60 = vpop.f32.mrb[17].mxu1 }
0x1421   :  { %v676_v61 = vpop.f32.mrb[18].mxu1 }
0x1422   :  { %1016 = vtanh.f32 %v679_v59  ;;  %v935_v62 = vpop.f32.mrb[19].mxu1  ;;  %v825_v0 = vmul.f32 -1.442695, %v679_v59 }
0x1424   :  { %1018 = vpow2.f32 %v825_v0 }
0x142c   :  { %v1017_v63 = vpop.eup %1016 }
0x142d   :  { %689 = vrot.lane.b32.xlu0 %v1017_v63, %s1051_s17 }
0x142e   :  { %v1019_v1 = vpop.eup %1018 }
0x142f   :  { %v683_v2 = vadd.f32 1.0, %v1019_v1 }
0x1431   :  { %1020 = vrcp.f32 %v683_v2 }
0x143b   :  { %v1021_v4 = vpop.eup %1020 }
0x143c   :  { %v687_v17 = vmul.f32 %v1021_v4, %v625_v51 }
0x149f   :  { %v690_v5 = vpop.permute.xlu0 %689 }
0x14a0   :  { %v692_v7 = vmul.f32 %v1021_v4, %v690_v5 }
0x14a2   :  { %694 = vrot.lane.b32.xlu1 %v692_v7, %s1052_s3 }
0x1514   :  { %v695_v9 = vpop.permute.xlu1 %694 }
0x1515   :  { %v697_v11 = vadd.f32 %v695_v9, %v687_v17 }
0x1517   :  { %1022 = vtanh.f32 %v697_v11 }
0x1521   :  { %v1023_v23 = vpop.eup %1022 }
0x1522   :  { %700 = vrot.lane.b32.xlu0 %v1023_v23, %s1051_s17 }
0x1594   :  { %v701_v24 = vpop.permute.xlu0 %700 }
0x1595   :  { %v703_v25 = vmul.f32 %v1021_v4, %v701_v24 }
0x1597   :  { %716 = vrot.lane.b32.xlu1 %v703_v25, %s1052_s3 }
0x1609   :  { %v717_v26 = vpop.permute.xlu1 %716 }
0x160a   :  { %945 = vmatmul.mubr.msk.f32.vlgmr.msra.gmra.mrb[20].mxu0 %vm131_vm2, %v717_v26 }
0x16dd   :  { %v786_v28 = vpop.f32.mrb[20].mxu0 }
0x16de   :  { %v787_v8 = vadd.f32 %v826_v27, %v786_v28  ;;  %v946_v18 = vpop.f32.mrb[21].mxu0 }
0x16e0   :  { %791 = vst.msk [vmem:[#allocation2] sm:$0xff] %vm790_vm3, %v787_v8 }
0x16e1   :  { %1035 = shalt.err (!%p1032_p4)
}
0x16e2   :  { %s1036_s14 = scalar_lea.hbm %s1294_s6, 128 }
0x16e3   :  { %p1037_p5 = scmp.ne.s32.totalorder %s1294_s6, %s1036_s14  ;;  %p1040_p6 = scmp.lt.u32.totalorder %s1036_s14, %s1294_s6 }
0x16e5   :  { %p1042_p7 = pnand %p1040_p6, %p1037_p5 }
0x16e7   :  { %1045 = shalt.err (!%p1042_p7)
}
0x16e8   :  { %801 = dma.vmem_to_hbm [thread:$0]  %s799_s4, 128, %s1294_s6, [#allocation3]  }
0x16e9   :  { %1046 = dma.done.wait [#allocation3], 128  }
0x16ea   :  { %1047 = vsyncadd [#allocation3], 4294967168 }
0x16eb   :  { %805 = vsyncpa [#allocation3], 1 }

</bundles_post_ra>
